<compile_context>
chip_gen: v7x
topology: tpu7x:2x2x1
jax: 0.10.0
libtpu: 0.0.40
codegen_flags: <defaults>
</compile_context>

<pallas_src>
import functools

import jax
import jax.numpy as jnp
from jax import lax
from jax.experimental import pallas as pl
from jax.experimental.pallas import tpu as pltpu


def _round_up(v, m):
    return ((v + m - 1) // m) * m


def _lr_rnn_chunk_kernel(x_ref, noise_ref, h0_ref, b_ref, n_ref, mT_ref,
                         wi_ref, wo_ref, out_ref,
                         hbuf, w_sc, h_sc, r_sc,
                         *, one_minus_alpha, noise_std, ts, bt, hp, out_w,
                         unroll):
    """One grid step = `ts` timesteps of the recurrence for one batch tile.

    x_ref     : (ts, bt, I)   time-major input chunk
    noise_ref : (ts, bt, Hp)  time-major pre-sampled noise chunk
    h0_ref    : (1, Hp)       initial hidden state
    b_ref     : (1, Hp)       bias inside the recurrent non-linearity
    n_ref     : (Hp, R)       n * (alpha / hidden_size)
    mT_ref    : (R, Hp)       m^T (zero padded rows/cols)
    wi_ref    : (I, Hp)       alpha * wi * si[:, None]
    wo_ref    : (Hp, O)       wo * so[None, :]
    out_ref   : (ts, bt, O)   per-chunk output
    hbuf      : (ts*bt, Hp)   chunk workspace: drive before the loop, raw h_t
                              after it (rows time-major: row = t*bt + b)
    w_sc      : (Hp, Hp)      W = n_scaled @ m^T, formed once per batch tile
    h_sc/r_sc : (bt, Hp)      recurrent carry, persists across time chunks
    """
    c = pl.program_id(1)                      # time-chunk index (sequential)

    # ---- init once per batch tile (first time chunk) -----------------------
    @pl.when(c == 0)
    def _():
        w_sc[...] = jnp.dot(n_ref[...], mT_ref[...],
                            preferred_element_type=jnp.float32)
        h0 = jnp.broadcast_to(h0_ref[...], (bt, hp))
        h_sc[...] = h0
        r_sc[...] = jnp.tanh(h0)              # module: r0 = tanh(h0) (no bias)

    # ---- chunk-level drive: alpha*(x @ wi_full) + noise_std*noise ----------
    x2 = x_ref[...].reshape(ts * bt, x_ref.shape[-1])
    hbuf[...] = jnp.dot(x2, wi_ref[...], preferred_element_type=jnp.float32)
    hbuf[...] += noise_std * noise_ref[...].reshape(ts * bt, hp)

    # hoisted out of the serial loop (JAX does not CSE broadcast_in_dim)
    b_b = jnp.broadcast_to(b_ref[...], (bt, hp))
    w = w_sc[...]

    def step(t, carry):
        h, r = carry
        start = pl.multiple_of(t * bt, bt)
        d = hbuf[pl.ds(start, bt), :]                       # drive_t
        rec = jnp.dot(r, w, preferred_element_type=jnp.float32)
        h_new = one_minus_alpha * h + d + rec
        hbuf[pl.ds(start, bt), :] = h_new                   # raw h_t; tanh + readout later
        r_new = jnp.tanh(h_new + b_b)
        return h_new, r_new

    h, r = lax.fori_loop(0, ts, step, (h_sc[...], r_sc[...]), unroll=unroll)
    h_sc[...] = h
    r_sc[...] = r

    # ---- chunk-level readout: one (ts*bt, Hp) @ (Hp, O) matmul -------------
    th = jnp.tanh(hbuf[...])
    o2 = jnp.dot(th, wo_ref[...], preferred_element_type=jnp.float32)
    out_ref[...] = o2.reshape(ts, bt, out_w)


def lr_rnn_forward(x, noise_tbh, params, *, noise_std, alpha,
                   time_chunk=None, batch_tile=64,
                   vmem_budget_bytes=40 << 20):
    """
    x         : (batch, T, input_size)  float32 (module input contract)
    noise_tbh : (T, batch, hidden_size) float32, time-major pre-sampled noise;
                noise_tbh[t] plays the role of torch's internally sampled
                noise[:, t, :].
    returns   : (batch, T, output_size) matching the PyTorch module.
    """
    B, T, I = x.shape
    H, R = params["m"].shape
    O = params["wo"].shape[1]
    assert noise_tbh.shape == (T, B, H)
    f32 = jnp.float32
    LANE = 128

    Hp = _round_up(max(H, 1), LANE)

    # ---- proxy parameters (_define_proxy_parameters) + one-time folds/pads --
    wi_full = params["wi"].astype(f32) * params["si"].astype(f32)[:, None]   # (I, H)
    wo_full = params["wo"].astype(f32) * params["so"].astype(f32)[None, :]   # (H, O)
    wi_a = jnp.pad(alpha * wi_full, ((0, 0), (0, Hp - H)))                   # (I, Hp)
    wo_p = jnp.pad(wo_full, ((0, Hp - H), (0, 0)))                           # (Hp, O)
    n_scaled = jnp.pad(params["n"].astype(f32) * (alpha / float(H)),
                       ((0, Hp - H), (0, 0)))                                # (Hp, R)
    mT = jnp.pad(params["m"].astype(f32), ((0, Hp - H), (0, 0))).T           # (R, Hp)
    h0_row = jnp.pad(params["h0"].astype(f32), (0, Hp - H))[None, :]         # (1, Hp)
    b_row = jnp.pad(params["b"].astype(f32), (0, Hp - H))[None, :]           # (1, Hp)

    # ---- batch tiling (parallel grid axis; gives 2x on v7x's 2 TensorCores) -
    bt = min(_round_up(batch_tile, 8), _round_up(B, 8))
    Bp = _round_up(B, bt)

    # ---- time-chunk auto-sizing against a VMEM budget ------------------------
    # per-ts bytes: noise stream (2 bufs) + hbuf scratch (=3*Hp), x stream and
    # output stream (2 bufs each, lane-padded).  fixed: W, carries, constants.
    per_ts_bytes = 4 * bt * (3 * Hp
                             + 2 * _round_up(I, LANE)
                             + 2 * _round_up(O, LANE))
    fixed_bytes = 4 * (Hp * Hp + 2 * bt * Hp
                       + 2 * (Hp * LANE + Hp * _round_up(O, LANE) + 32 * Hp))
    if time_chunk is None:
        ts = ((vmem_budget_bytes - fixed_bytes) // max(per_ts_bytes, 1)) // 8 * 8
        ts = int(max(8, min(ts, 512)))
    else:
        ts = int(max(8, _round_up(time_chunk, 8)))
    ts = min(ts, _round_up(T, 8))
    Tp = _round_up(T, ts)
    # v5e: default scoped VMEM is only 16 MiB -> raise explicitly.
    # v7x: 64 MiB physical -> keep vmem_budget_bytes <= ~44 MiB there.
    vmem_limit = int(min(100 << 20,
                         max(32 << 20,
                             fixed_bytes + ts * per_ts_bytes + (12 << 20))))

    # ---- pad / relayout inputs (x relayout is tiny: I << H; all pads are
    # no-ops when shapes are already aligned) ---------------------------------
    x_t = jnp.transpose(x.astype(f32), (1, 0, 2))                  # (T, B, I)
    x_t = jnp.pad(x_t, ((0, Tp - T), (0, Bp - B), (0, 0)))
    noise_t = jnp.pad(noise_tbh.astype(f32),
                      ((0, Tp - T), (0, Bp - B), (0, Hp - H)))

    kernel = functools.partial(
        _lr_rnn_chunk_kernel,
        one_minus_alpha=float(1.0 - alpha), noise_std=float(noise_std),
        ts=ts, bt=bt, hp=Hp, out_w=O, unroll=int(min(8, ts)))

    def const(shape):
        return pl.BlockSpec(shape, lambda b, c: (0, 0))

    out_p = pl.pallas_call(
        kernel,
        out_shape=jax.ShapeDtypeStruct((Tp, Bp, O), f32),
        grid_spec=pltpu.PrefetchScalarGridSpec(
            num_scalar_prefetch=0,
            grid=(Bp // bt, Tp // ts),
            in_specs=[
                pl.BlockSpec((ts, bt, I), lambda b, c: (c, b, 0)),    # x chunk
                pl.BlockSpec((ts, bt, Hp), lambda b, c: (c, b, 0)),   # noise chunk
                const((1, Hp)),          # h0
                const((1, Hp)),          # b
                const((Hp, R)),          # n * alpha/H
                const((R, Hp)),          # m^T
                const((I, Hp)),          # alpha * wi_full
                const((Hp, O)),          # wo_full
            ],
            out_specs=pl.BlockSpec((ts, bt, O), lambda b, c: (c, b, 0)),
            scratch_shapes=[
                pltpu.VMEM((ts * bt, Hp), f32),   # hbuf (drive -> raw h)
                pltpu.VMEM((Hp, Hp), f32),        # W = n_scaled @ m^T
                pltpu.VMEM((bt, Hp), f32),        # h carry
                pltpu.VMEM((bt, Hp), f32),        # r carry
            ],
        ),
        compiler_params=pltpu.CompilerParams(
            dimension_semantics=("parallel", "arbitrary"),
            vmem_limit_bytes=vmem_limit,
        ),
    )(x_t, noise_t, h0_row, b_row, n_scaled, mT, wi_a, wo_p)

    # (Tp, Bp, O) -> (B, T, O); transposing the O-wide output is negligible.
    return jnp.transpose(out_p[:T, :B, :], (1, 0, 2))


def _reference_forward(x, noise_tbh, params, *, noise_std, alpha):
    """Pure-JAX reference mirroring the PyTorch loop (for a sanity check)."""
    B, T, I = x.shape
    H = params["m"].shape[0]
    wi_full = params["wi"] * params["si"][:, None]
    wo_full = params["wo"] * params["so"][None, :]
    h = jnp.broadcast_to(params["h0"][None, :], (B, H)).astype(jnp.float32)
    r = jnp.tanh(h)
    outs = []
    for i in range(T):
        h = h + noise_std * noise_tbh[i] + alpha * (
            -h + (r @ params["n"]) @ params["m"].T / H + x[:, i, :] @ wi_full)
        r = jnp.tanh(h + params["b"][None, :])
        outs.append(jnp.tanh(h) @ wo_full)
    return jnp.stack(outs, axis=1)


def _init_params(key, input_size, hidden_size, output_size, rank):
    """Deterministic init matching the PyTorch __init__ defaults."""
    k_wi, k_m, k_n, k_wo = jax.random.split(key, 4)
    return {
        "wi": jax.random.normal(k_wi, (input_size, hidden_size), jnp.float32),
        "si": jnp.ones((input_size,), jnp.float32),
        "m": jax.random.normal(k_m, (hidden_size, rank), jnp.float32),
        "n": jax.random.normal(k_n, (hidden_size, rank), jnp.float32),
        "b": jnp.zeros((hidden_size,), jnp.float32),
        "wo": jax.random.normal(k_wo, (hidden_size, output_size), jnp.float32)
              * (1.0 / hidden_size),
        "so": jnp.ones((output_size,), jnp.float32),
        "h0": jnp.zeros((hidden_size,), jnp.float32),
    }


if __name__ == "__main__":
    batch, T = 2, 8
    input_size, hidden_size, output_size, rank = 4, 32, 3, 2
    noise_std, alpha = 0.05, 0.2

    key = jax.random.PRNGKey(0)
    k_params, k_x, k_noise = jax.random.split(key, 3)

    params = _init_params(k_params, input_size, hidden_size, output_size, rank)
    x = jax.random.normal(k_x, (batch, T, input_size), jnp.float32)
    # Time-major pre-sampled noise; noise_tbh[t] == torch's noise[:, t, :]
    # (the torch module samples this internally with torch.randn).
    noise_tbh = jax.random.normal(k_noise, (T, batch, hidden_size), jnp.float32)

    out = lr_rnn_forward(x, noise_tbh, params, noise_std=noise_std, alpha=alpha)
    out = jax.block_until_ready(out)

    with jax.default_matmul_precision("highest"):
        ref = _reference_forward(x, noise_tbh, params,
                                 noise_std=noise_std, alpha=alpha)
    assert out.shape == (batch, T, output_size)
    err = float(jnp.max(jnp.abs(out - ref)))
    assert jnp.allclose(out, ref, atol=1e-3, rtol=1e-2), f"mismatch vs reference: {err}"

    print("KERNEL_OK")
</pallas_src>

<mosaic_0001>
module attributes {stable_mosaic.version = 11 : i64} {
  func.func @_lr_rnn_chunk_kernel(%arg0: i32, %arg1: i32, %arg2: memref<8x8x4xf32, #tpu.memory_space<vmem>>, %arg3: memref<8x8x128xf32, #tpu.memory_space<vmem>>, %arg4: memref<1x128xf32, #tpu.memory_space<vmem>>, %arg5: memref<1x128xf32, #tpu.memory_space<vmem>>, %arg6: memref<128x2xf32, #tpu.memory_space<vmem>>, %arg7: memref<2x128xf32, #tpu.memory_space<vmem>>, %arg8: memref<4x128xf32, #tpu.memory_space<vmem>>, %arg9: memref<128x3xf32, #tpu.memory_space<vmem>>, %arg10: memref<8x8x3xf32, #tpu.memory_space<vmem>>, %arg11: memref<64x128xf32, #tpu.memory_space<vmem>>, %arg12: memref<128x128xf32, #tpu.memory_space<vmem>>, %arg13: memref<8x128xf32, #tpu.memory_space<vmem>>, %arg14: memref<8x128xf32, #tpu.memory_space<vmem>>) attributes {dimension_semantics = [#tpu.dimension_semantics<parallel>, #tpu.dimension_semantics<arbitrary>], iteration_bounds = array<i64: 1, 1>, scalar_prefetch = 0 : i64, scratch_operands = 4 : i64, tpu.core_type = #tpu.core_type<tc>, window_params = [{transform_indices = @transform_0, window_bounds = array<i64: 8, 8, 4>}, {transform_indices = @transform_1, window_bounds = array<i64: 8, 8, 128>}, {pipeline_mode = #tpu.pipeline_mode<synchronous>, transform_indices = @transform_2, window_bounds = array<i64: 1, 128>}, {pipeline_mode = #tpu.pipeline_mode<synchronous>, transform_indices = @transform_3, window_bounds = array<i64: 1, 128>}, {pipeline_mode = #tpu.pipeline_mode<synchronous>, transform_indices = @transform_4, window_bounds = array<i64: 128, 2>}, {pipeline_mode = #tpu.pipeline_mode<synchronous>, transform_indices = @transform_5, window_bounds = array<i64: 2, 128>}, {pipeline_mode = #tpu.pipeline_mode<synchronous>, transform_indices = @transform_6, window_bounds = array<i64: 4, 128>}, {pipeline_mode = #tpu.pipeline_mode<synchronous>, transform_indices = @transform_7, window_bounds = array<i64: 128, 3>}, {transform_indices = @transform_8, window_bounds = array<i64: 8, 8, 3>}]} {
    %c0_i32 = arith.constant 0 : i32
    %0 = arith.cmpi eq, %arg1, %c0_i32 : i32
    %1 = arith.extui %0 : i1 to i32
    %c0_i32_0 = arith.constant 0 : i32
    %2 = arith.cmpi ne, %1, %c0_i32_0 : i32
    scf.if %2 {
      %c0_76 = arith.constant 0 : index
      %c0_77 = arith.constant 0 : index
      %133 = vector.load %arg6[%c0_76, %c0_77] : memref<128x2xf32, #tpu.memory_space<vmem>>, vector<128x2xf32>
      %c0_78 = arith.constant 0 : index
      %c0_79 = arith.constant 0 : index
      %134 = vector.load %arg7[%c0_78, %c0_79] : memref<2x128xf32, #tpu.memory_space<vmem>>, vector<2x128xf32>
      %cst_80 = arith.constant dense<0.000000e+00> : vector<128x128xf32>
      %135 = tpu.matmul %133, %134, %cst_80 {dimension_numbers = #tpu.dot_dimension_numbers<[1], [0], [0], [1], [0, 0, 1, 1], [], []>} : vector<128x2xf32>, vector<2x128xf32>, vector<128x128xf32> -> vector<128x128xf32>
      %c0_81 = arith.constant 0 : index
      %c0_82 = arith.constant 0 : index
      %136 = vector.load %arg12[%c0_81, %c0_82] : memref<128x128xf32, #tpu.memory_space<vmem>>, vector<128x128xf32>
      tpu.vector_store %arg12[%c0_81, %c0_82], %135 {strides = array<i32>} : memref<128x128xf32, #tpu.memory_space<vmem>>, vector<128x128xf32>,
      %c0_83 = arith.constant 0 : index
      %c0_84 = arith.constant 0 : index
      %137 = vector.load %arg4[%c0_83, %c0_84] : memref<1x128xf32, #tpu.memory_space<vmem>>, vector<1x128xf32>
      %138 = vector.shape_cast %137 : vector<1x128xf32> to vector<1x128xf32>
      %139 = vector.broadcast %138 : vector<1x128xf32> to vector<8x128xf32>
      %c0_85 = arith.constant 0 : index
      %c0_86 = arith.constant 0 : index
      %140 = vector.load %arg13[%c0_85, %c0_86] : memref<8x128xf32, #tpu.memory_space<vmem>>, vector<8x128xf32>
      tpu.vector_store %arg13[%c0_85, %c0_86], %139 {strides = array<i32>} : memref<8x128xf32, #tpu.memory_space<vmem>>, vector<8x128xf32>,
      %141 = math.tanh %139 : vector<8x128xf32>
      %c0_87 = arith.constant 0 : index
      %c0_88 = arith.constant 0 : index
      %142 = vector.load %arg14[%c0_87, %c0_88] : memref<8x128xf32, #tpu.memory_space<vmem>>, vector<8x128xf32>
      tpu.vector_store %arg14[%c0_87, %c0_88], %141 {strides = array<i32>} : memref<8x128xf32, #tpu.memory_space<vmem>>, vector<8x128xf32>,
    } else {
    }
    %c0 = arith.constant 0 : index
    %c0_1 = arith.constant 0 : index
    %c0_2 = arith.constant 0 : index
    %3 = vector.load %arg2[%c0, %c0_1, %c0_2] : memref<8x8x4xf32, #tpu.memory_space<vmem>>, vector<8x8x4xf32>
    %4 = vector.shape_cast %3 : vector<8x8x4xf32> to vector<64x4xf32>
    %c0_3 = arith.constant 0 : index
    %c0_4 = arith.constant 0 : index
    %5 = vector.load %arg8[%c0_3, %c0_4] : memref<4x128xf32, #tpu.memory_space<vmem>>, vector<4x128xf32>
    %cst = arith.constant dense<0.000000e+00> : vector<64x128xf32>
    %6 = tpu.matmul %4, %5, %cst {dimension_numbers = #tpu.dot_dimension_numbers<[1], [0], [0], [1], [0, 0, 1, 1], [], []>} : vector<64x4xf32>, vector<4x128xf32>, vector<64x128xf32> -> vector<64x128xf32>
    %c0_5 = arith.constant 0 : index
    %c0_6 = arith.constant 0 : index
    %7 = vector.load %arg11[%c0_5, %c0_6] : memref<64x128xf32, #tpu.memory_space<vmem>>, vector<64x128xf32>
    tpu.vector_store %arg11[%c0_5, %c0_6], %6 {strides = array<i32>} : memref<64x128xf32, #tpu.memory_space<vmem>>, vector<64x128xf32>,
    %c0_7 = arith.constant 0 : index
    %c0_8 = arith.constant 0 : index
    %8 = vector.load %arg11[%c0_7, %c0_8] : memref<64x128xf32, #tpu.memory_space<vmem>>, vector<64x128xf32>
    %c0_9 = arith.constant 0 : index
    %c0_10 = arith.constant 0 : index
    %c0_11 = arith.constant 0 : index
    %9 = vector.load %arg3[%c0_9, %c0_10, %c0_11] : memref<8x8x128xf32, #tpu.memory_space<vmem>>, vector<8x8x128xf32>
    %10 = vector.shape_cast %9 : vector<8x8x128xf32> to vector<64x128xf32>
    %cst_12 = arith.constant 5.000000e-02 : f32
    %11 = vector.broadcast %cst_12 : f32 to vector<64x128xf32>
    %12 = arith.mulf %11, %10 : vector<64x128xf32>
    %13 = arith.addf %8, %12 : vector<64x128xf32>
    %c0_13 = arith.constant 0 : index
    %c0_14 = arith.constant 0 : index
    %14 = vector.load %arg11[%c0_13, %c0_14] : memref<64x128xf32, #tpu.memory_space<vmem>>, vector<64x128xf32>
    tpu.vector_store %arg11[%c0_13, %c0_14], %13 {strides = array<i32>} : memref<64x128xf32, #tpu.memory_space<vmem>>, vector<64x128xf32>,
    %c0_15 = arith.constant 0 : index
    %c0_16 = arith.constant 0 : index
    %15 = vector.load %arg5[%c0_15, %c0_16] : memref<1x128xf32, #tpu.memory_space<vmem>>, vector<1x128xf32>
    %16 = vector.shape_cast %15 : vector<1x128xf32> to vector<1x128xf32>
    %17 = vector.broadcast %16 : vector<1x128xf32> to vector<8x128xf32>
    %c0_17 = arith.constant 0 : index
    %c0_18 = arith.constant 0 : index
    %18 = vector.load %arg12[%c0_17, %c0_18] : memref<128x128xf32, #tpu.memory_space<vmem>>, vector<128x128xf32>
    %c0_19 = arith.constant 0 : index
    %c0_20 = arith.constant 0 : index
    %19 = vector.load %arg13[%c0_19, %c0_20] : memref<8x128xf32, #tpu.memory_space<vmem>>, vector<8x128xf32>
    %c0_21 = arith.constant 0 : index
    %c0_22 = arith.constant 0 : index
    %20 = vector.load %arg14[%c0_21, %c0_22] : memref<8x128xf32, #tpu.memory_space<vmem>>, vector<8x128xf32>
    %c0_i32_23 = arith.constant 0 : i32
    %c8_i32 = arith.constant 8 : i32
    %21 = arith.muli %c0_i32_23, %c8_i32 : i32
    %22 = tpu.assume_multiple %21, 8 : i32
    %23 = arith.index_cast %22 : i32 to index
    %c0_24 = arith.constant 0 : index
    %24 = vector.load %arg11[%23, %c0_24] : memref<64x128xf32, #tpu.memory_space<vmem>>, vector<8x128xf32>
    %cst_25 = arith.constant dense<0.000000e+00> : vector<8x128xf32>
    %25 = tpu.matmul %20, %18, %cst_25 {dimension_numbers = #tpu.dot_dimension_numbers<[1], [0], [0], [1], [0, 0, 1, 1], [], []>} : vector<8x128xf32>, vector<128x128xf32>, vector<8x128xf32> -> vector<8x128xf32>
    %cst_26 = arith.constant 8.000000e-01 : f32
    %26 = vector.broadcast %cst_26 : f32 to vector<8x128xf32>
    %27 = arith.mulf %26, %19 : vector<8x128xf32>
    %28 = arith.addf %27, %24 : vector<8x128xf32>
    %29 = arith.addf %28, %25 : vector<8x128xf32>
    %30 = arith.index_cast %22 : i32 to index
    %c0_27 = arith.constant 0 : index
    %31 = vector.load %arg11[%30, %c0_27] : memref<64x128xf32, #tpu.memory_space<vmem>>, vector<8x128xf32>
    tpu.vector_store %arg11[%30, %c0_27], %29 {strides = array<i32>} : memref<64x128xf32, #tpu.memory_space<vmem>>, vector<8x128xf32>,
    %32 = arith.addf %29, %17 : vector<8x128xf32>
    %33 = math.tanh %32 : vector<8x128xf32>
    %c1_i32 = arith.constant 1 : i32
    %c8_i32_28 = arith.constant 8 : i32
    %34 = arith.muli %c1_i32, %c8_i32_28 : i32
    %35 = tpu.assume_multiple %34, 8 : i32
    %36 = arith.index_cast %35 : i32 to index
    %c0_29 = arith.constant 0 : index
    %37 = vector.load %arg11[%36, %c0_29] : memref<64x128xf32, #tpu.memory_space<vmem>>, vector<8x128xf32>
    %cst_30 = arith.constant dense<0.000000e+00> : vector<8x128xf32>
    %38 = tpu.matmul %33, %18, %cst_30 {dimension_numbers = #tpu.dot_dimension_numbers<[1], [0], [0], [1], [0, 0, 1, 1], [], []>} : vector<8x128xf32>, vector<128x128xf32>, vector<8x128xf32> -> vector<8x128xf32>
    %cst_31 = arith.constant 8.000000e-01 : f32
    %39 = vector.broadcast %cst_31 : f32 to vector<8x128xf32>
    %40 = arith.mulf %39, %29 : vector<8x128xf32>
    %41 = arith.addf %40, %37 : vector<8x128xf32>
    %42 = arith.addf %41, %38 : vector<8x128xf32>
    %43 = arith.index_cast %35 : i32 to index
    %c0_32 = arith.constant 0 : index
    %44 = vector.load %arg11[%43, %c0_32] : memref<64x128xf32, #tpu.memory_space<vmem>>, vector<8x128xf32>
    tpu.vector_store %arg11[%43, %c0_32], %42 {strides = array<i32>} : memref<64x128xf32, #tpu.memory_space<vmem>>, vector<8x128xf32>,
    %45 = arith.addf %42, %17 : vector<8x128xf32>
    %46 = math.tanh %45 : vector<8x128xf32>
    %c2_i32 = arith.constant 2 : i32
    %c8_i32_33 = arith.constant 8 : i32
    %47 = arith.muli %c2_i32, %c8_i32_33 : i32
    %48 = tpu.assume_multiple %47, 8 : i32
    %49 = arith.index_cast %48 : i32 to index
    %c0_34 = arith.constant 0 : index
    %50 = vector.load %arg11[%49, %c0_34] : memref<64x128xf32, #tpu.memory_space<vmem>>, vector<8x128xf32>
    %cst_35 = arith.constant dense<0.000000e+00> : vector<8x128xf32>
    %51 = tpu.matmul %46, %18, %cst_35 {dimension_numbers = #tpu.dot_dimension_numbers<[1], [0], [0], [1], [0, 0, 1, 1], [], []>} : vector<8x128xf32>, vector<128x128xf32>, vector<8x128xf32> -> vector<8x128xf32>
    %cst_36 = arith.constant 8.000000e-01 : f32
    %52 = vector.broadcast %cst_36 : f32 to vector<8x128xf32>
    %53 = arith.mulf %52, %42 : vector<8x128xf32>
    %54 = arith.addf %53, %50 : vector<8x128xf32>
    %55 = arith.addf %54, %51 : vector<8x128xf32>
    %56 = arith.index_cast %48 : i32 to index
    %c0_37 = arith.constant 0 : index
    %57 = vector.load %arg11[%56, %c0_37] : memref<64x128xf32, #tpu.memory_space<vmem>>, vector<8x128xf32>
    tpu.vector_store %arg11[%56, %c0_37], %55 {strides = array<i32>} : memref<64x128xf32, #tpu.memory_space<vmem>>, vector<8x128xf32>,
    %58 = arith.addf %55, %17 : vector<8x128xf32>
    %59 = math.tanh %58 : vector<8x128xf32>
    %c3_i32 = arith.constant 3 : i32
    %c8_i32_38 = arith.constant 8 : i32
    %60 = arith.muli %c3_i32, %c8_i32_38 : i32
    %61 = tpu.assume_multiple %60, 8 : i32
    %62 = arith.index_cast %61 : i32 to index
    %c0_39 = arith.constant 0 : index
    %63 = vector.load %arg11[%62, %c0_39] : memref<64x128xf32, #tpu.memory_space<vmem>>, vector<8x128xf32>
    %cst_40 = arith.constant dense<0.000000e+00> : vector<8x128xf32>
    %64 = tpu.matmul %59, %18, %cst_40 {dimension_numbers = #tpu.dot_dimension_numbers<[1], [0], [0], [1], [0, 0, 1, 1], [], []>} : vector<8x128xf32>, vector<128x128xf32>, vector<8x128xf32> -> vector<8x128xf32>
    %cst_41 = arith.constant 8.000000e-01 : f32
    %65 = vector.broadcast %cst_41 : f32 to vector<8x128xf32>
    %66 = arith.mulf %65, %55 : vector<8x128xf32>
    %67 = arith.addf %66, %63 : vector<8x128xf32>
    %68 = arith.addf %67, %64 : vector<8x128xf32>
    %69 = arith.index_cast %61 : i32 to index
    %c0_42 = arith.constant 0 : index
    %70 = vector.load %arg11[%69, %c0_42] : memref<64x128xf32, #tpu.memory_space<vmem>>, vector<8x128xf32>
    tpu.vector_store %arg11[%69, %c0_42], %68 {strides = array<i32>} : memref<64x128xf32, #tpu.memory_space<vmem>>, vector<8x128xf32>,
    %71 = arith.addf %68, %17 : vector<8x128xf32>
    %72 = math.tanh %71 : vector<8x128xf32>
    %c4_i32 = arith.constant 4 : i32
    %c8_i32_43 = arith.constant 8 : i32
    %73 = arith.muli %c4_i32, %c8_i32_43 : i32
    %74 = tpu.assume_multiple %73, 8 : i32
    %75 = arith.index_cast %74 : i32 to index
    %c0_44 = arith.constant 0 : index
    %76 = vector.load %arg11[%75, %c0_44] : memref<64x128xf32, #tpu.memory_space<vmem>>, vector<8x128xf32>
    %cst_45 = arith.constant dense<0.000000e+00> : vector<8x128xf32>
    %77 = tpu.matmul %72, %18, %cst_45 {dimension_numbers = #tpu.dot_dimension_numbers<[1], [0], [0], [1], [0, 0, 1, 1], [], []>} : vector<8x128xf32>, vector<128x128xf32>, vector<8x128xf32> -> vector<8x128xf32>
    %cst_46 = arith.constant 8.000000e-01 : f32
    %78 = vector.broadcast %cst_46 : f32 to vector<8x128xf32>
    %79 = arith.mulf %78, %68 : vector<8x128xf32>
    %80 = arith.addf %79, %76 : vector<8x128xf32>
    %81 = arith.addf %80, %77 : vector<8x128xf32>
    %82 = arith.index_cast %74 : i32 to index
    %c0_47 = arith.constant 0 : index
    %83 = vector.load %arg11[%82, %c0_47] : memref<64x128xf32, #tpu.memory_space<vmem>>, vector<8x128xf32>
    tpu.vector_store %arg11[%82, %c0_47], %81 {strides = array<i32>} : memref<64x128xf32, #tpu.memory_space<vmem>>, vector<8x128xf32>,
    %84 = arith.addf %81, %17 : vector<8x128xf32>
    %85 = math.tanh %84 : vector<8x128xf32>
    %c5_i32 = arith.constant 5 : i32
    %c8_i32_48 = arith.constant 8 : i32
    %86 = arith.muli %c5_i32, %c8_i32_48 : i32
    %87 = tpu.assume_multiple %86, 8 : i32
    %88 = arith.index_cast %87 : i32 to index
    %c0_49 = arith.constant 0 : index
    %89 = vector.load %arg11[%88, %c0_49] : memref<64x128xf32, #tpu.memory_space<vmem>>, vector<8x128xf32>
    %cst_50 = arith.constant dense<0.000000e+00> : vector<8x128xf32>
    %90 = tpu.matmul %85, %18, %cst_50 {dimension_numbers = #tpu.dot_dimension_numbers<[1], [0], [0], [1], [0, 0, 1, 1], [], []>} : vector<8x128xf32>, vector<128x128xf32>, vector<8x128xf32> -> vector<8x128xf32>
    %cst_51 = arith.constant 8.000000e-01 : f32
    %91 = vector.broadcast %cst_51 : f32 to vector<8x128xf32>
    %92 = arith.mulf %91, %81 : vector<8x128xf32>
    %93 = arith.addf %92, %89 : vector<8x128xf32>
    %94 = arith.addf %93, %90 : vector<8x128xf32>
    %95 = arith.index_cast %87 : i32 to index
    %c0_52 = arith.constant 0 : index
    %96 = vector.load %arg11[%95, %c0_52] : memref<64x128xf32, #tpu.memory_space<vmem>>, vector<8x128xf32>
    tpu.vector_store %arg11[%95, %c0_52], %94 {strides = array<i32>} : memref<64x128xf32, #tpu.memory_space<vmem>>, vector<8x128xf32>,
    %97 = arith.addf %94, %17 : vector<8x128xf32>
    %98 = math.tanh %97 : vector<8x128xf32>
    %c6_i32 = arith.constant 6 : i32
    %c8_i32_53 = arith.constant 8 : i32
    %99 = arith.muli %c6_i32, %c8_i32_53 : i32
    %100 = tpu.assume_multiple %99, 8 : i32
    %101 = arith.index_cast %100 : i32 to index
    %c0_54 = arith.constant 0 : index
    %102 = vector.load %arg11[%101, %c0_54] : memref<64x128xf32, #tpu.memory_space<vmem>>, vector<8x128xf32>
    %cst_55 = arith.constant dense<0.000000e+00> : vector<8x128xf32>
    %103 = tpu.matmul %98, %18, %cst_55 {dimension_numbers = #tpu.dot_dimension_numbers<[1], [0], [0], [1], [0, 0, 1, 1], [], []>} : vector<8x128xf32>, vector<128x128xf32>, vector<8x128xf32> -> vector<8x128xf32>
    %cst_56 = arith.constant 8.000000e-01 : f32
    %104 = vector.broadcast %cst_56 : f32 to vector<8x128xf32>
    %105 = arith.mulf %104, %94 : vector<8x128xf32>
    %106 = arith.addf %105, %102 : vector<8x128xf32>
    %107 = arith.addf %106, %103 : vector<8x128xf32>
    %108 = arith.index_cast %100 : i32 to index
    %c0_57 = arith.constant 0 : index
    %109 = vector.load %arg11[%108, %c0_57] : memref<64x128xf32, #tpu.memory_space<vmem>>, vector<8x128xf32>
    tpu.vector_store %arg11[%108, %c0_57], %107 {strides = array<i32>} : memref<64x128xf32, #tpu.memory_space<vmem>>, vector<8x128xf32>,
    %110 = arith.addf %107, %17 : vector<8x128xf32>
    %111 = math.tanh %110 : vector<8x128xf32>
    %c7_i32 = arith.constant 7 : i32
    %c8_i32_58 = arith.constant 8 : i32
    %112 = arith.muli %c7_i32, %c8_i32_58 : i32
    %113 = tpu.assume_multiple %112, 8 : i32
    %114 = arith.index_cast %113 : i32 to index
    %c0_59 = arith.constant 0 : index
    %115 = vector.load %arg11[%114, %c0_59] : memref<64x128xf32, #tpu.memory_space<vmem>>, vector<8x128xf32>
    %cst_60 = arith.constant dense<0.000000e+00> : vector<8x128xf32>
    %116 = tpu.matmul %111, %18, %cst_60 {dimension_numbers = #tpu.dot_dimension_numbers<[1], [0], [0], [1], [0, 0, 1, 1], [], []>} : vector<8x128xf32>, vector<128x128xf32>, vector<8x128xf32> -> vector<8x128xf32>
    %cst_61 = arith.constant 8.000000e-01 : f32
    %117 = vector.broadcast %cst_61 : f32 to vector<8x128xf32>
    %118 = arith.mulf %117, %107 : vector<8x128xf32>
    %119 = arith.addf %118, %115 : vector<8x128xf32>
    %120 = arith.addf %119, %116 : vector<8x128xf32>
    %121 = arith.index_cast %113 : i32 to index
    %c0_62 = arith.constant 0 : index
    %122 = vector.load %arg11[%121, %c0_62] : memref<64x128xf32, #tpu.memory_space<vmem>>, vector<8x128xf32>
    tpu.vector_store %arg11[%121, %c0_62], %120 {strides = array<i32>} : memref<64x128xf32, #tpu.memory_space<vmem>>, vector<8x128xf32>,
    %123 = arith.addf %120, %17 : vector<8x128xf32>
    %124 = math.tanh %123 : vector<8x128xf32>
    %c8_i32_63 = arith.constant 8 : i32
    %c0_64 = arith.constant 0 : index
    %c0_65 = arith.constant 0 : index
    %125 = vector.load %arg13[%c0_64, %c0_65] : memref<8x128xf32, #tpu.memory_space<vmem>>, vector<8x128xf32>
    tpu.vector_store %arg13[%c0_64, %c0_65], %120 {strides = array<i32>} : memref<8x128xf32, #tpu.memory_space<vmem>>, vector<8x128xf32>,
    %c0_66 = arith.constant 0 : index
    %c0_67 = arith.constant 0 : index
    %126 = vector.load %arg14[%c0_66, %c0_67] : memref<8x128xf32, #tpu.memory_space<vmem>>, vector<8x128xf32>
    tpu.vector_store %arg14[%c0_66, %c0_67], %124 {strides = array<i32>} : memref<8x128xf32, #tpu.memory_space<vmem>>, vector<8x128xf32>,
    %c0_68 = arith.constant 0 : index
    %c0_69 = arith.constant 0 : index
    %127 = vector.load %arg11[%c0_68, %c0_69] : memref<64x128xf32, #tpu.memory_space<vmem>>, vector<64x128xf32>
    %128 = math.tanh %127 : vector<64x128xf32>
    %c0_70 = arith.constant 0 : index
    %c0_71 = arith.constant 0 : index
    %129 = vector.load %arg9[%c0_70, %c0_71] : memref<128x3xf32, #tpu.memory_space<vmem>>, vector<128x3xf32>
    %cst_72 = arith.constant dense<0.000000e+00> : vector<64x3xf32>
    %130 = tpu.matmul %128, %129, %cst_72 {dimension_numbers = #tpu.dot_dimension_numbers<[1], [0], [0], [1], [0, 0, 1, 1], [], []>} : vector<64x128xf32>, vector<128x3xf32>, vector<64x3xf32> -> vector<64x3xf32>
    %131 = vector.shape_cast %130 : vector<64x3xf32> to vector<8x8x3xf32>
    %c0_73 = arith.constant 0 : index
    %c0_74 = arith.constant 0 : index
    %c0_75 = arith.constant 0 : index
    %132 = vector.load %arg10[%c0_73, %c0_74, %c0_75] : memref<8x8x3xf32, #tpu.memory_space<vmem>>, vector<8x8x3xf32>
    tpu.vector_store %arg10[%c0_73, %c0_74, %c0_75], %131 {strides = array<i32>} : memref<8x8x3xf32, #tpu.memory_space<vmem>>, vector<8x8x3xf32>,
    return
  }
  func.func @transform_0(%arg0: i32, %arg1: i32) -> (i32, i32, i32) {
    %c0_i32 = arith.constant 0 : i32
    %c0_i32_0 = arith.constant 0 : i32
    return %arg1, %arg0, %c0_i32 : i32, i32, i32
  }
  func.func @transform_1(%arg0: i32, %arg1: i32) -> (i32, i32, i32) {
    %c0_i32 = arith.constant 0 : i32
    %c0_i32_0 = arith.constant 0 : i32
    return %arg1, %arg0, %c0_i32 : i32, i32, i32
  }
  func.func @transform_2(%arg0: i32, %arg1: i32) -> (i32, i32) {
    %c0_i32 = arith.constant 0 : i32
    %c0_i32_0 = arith.constant 0 : i32
    %c0_i32_1 = arith.constant 0 : i32
    return %c0_i32, %c0_i32_0 : i32, i32
  }
  func.func @transform_3(%arg0: i32, %arg1: i32) -> (i32, i32) {
    %c0_i32 = arith.constant 0 : i32
    %c0_i32_0 = arith.constant 0 : i32
    %c0_i32_1 = arith.constant 0 : i32
    return %c0_i32, %c0_i32_0 : i32, i32
  }
  func.func @transform_4(%arg0: i32, %arg1: i32) -> (i32, i32) {
    %c0_i32 = arith.constant 0 : i32
    %c0_i32_0 = arith.constant 0 : i32
    %c0_i32_1 = arith.constant 0 : i32
    return %c0_i32, %c0_i32_0 : i32, i32
  }
  func.func @transform_5(%arg0: i32, %arg1: i32) -> (i32, i32) {
    %c0_i32 = arith.constant 0 : i32
    %c0_i32_0 = arith.constant 0 : i32
    %c0_i32_1 = arith.constant 0 : i32
    return %c0_i32, %c0_i32_0 : i32, i32
  }
  func.func @transform_6(%arg0: i32, %arg1: i32) -> (i32, i32) {
    %c0_i32 = arith.constant 0 : i32
    %c0_i32_0 = arith.constant 0 : i32
    %c0_i32_1 = arith.constant 0 : i32
    return %c0_i32, %c0_i32_0 : i32, i32
  }
  func.func @transform_7(%arg0: i32, %arg1: i32) -> (i32, i32) {
    %c0_i32 = arith.constant 0 : i32
    %c0_i32_0 = arith.constant 0 : i32
    %c0_i32_1 = arith.constant 0 : i32
    return %c0_i32, %c0_i32_0 : i32, i32
  }
  func.func @transform_8(%arg0: i32, %arg1: i32) -> (i32, i32, i32) {
    %c0_i32 = arith.constant 0 : i32
    %c0_i32_0 = arith.constant 0 : i32
    return %arg1, %arg0, %c0_i32 : i32, i32, i32
  }
}

</mosaic_0001>

<bundles_post_ra>
// kernel: tpu_custom_call.1
= control target key start
LH: loop header
LB: loop body
LE: loop exit
PB: predicated region body
PF: predicated region fallthrough
CT: control target
= control target key end

     0   :  { %vm99_vm0 = vcmask 1041408   ;;  %vm50_vm1 = vcmask 15360   ;;  %vm308_vm2 = vcmask 1043456   ;;  %vm283_vm3 = vcmask 31744   ;;  %s2575_s5 = inlined_call_operand.vmem [shape: f32[2,128], index: 5, kind: input, shape index: {}]   ;;  %s2576_s4 = inlined_call_operand.vmem [shape: f32[128,2], index: 4, kind: input, shape index: {}]   ;;  %s2577_s6 = inlined_call_operand.vmem [shape: f32[4,128], index: 6, kind: input, shape index: {}]   ;;  %s2578_s0 = inlined_call_operand.vmem [shape: f32[8,8,4], index: 0, kind: input, shape index: {}]   ;;  %s2579_s2 = inlined_call_operand.vmem [shape: f32[1,128], index: 2, kind: input, shape index: {}]   ;;  %s2580_s1 = inlined_call_operand.vmem [shape: f32[8,8,128], index: 1, kind: input, shape index: {}]   ;;  %s2581_s3 = inlined_call_operand.vmem [shape: f32[1,128], index: 3, kind: input, shape index: {}]   ;;  %s2582_s7 = inlined_call_operand.vmem [shape: f32[128,3], index: 7, kind: input, shape index: {}]   ;;  %s2583_s8 = inlined_call_operand.vmem [shape: f32[8,8,3], index: 8, kind: output, shape index: {}]  }
   0x1   :  { %v49_v0 = vld [vmem:[%s2575_s5] sm:$0x3]  ;;  %v34_v2 = vld [vmem:[%s2576_s4 + $0x8] sm:$0xff]  ;;  %v35_v3 = vld [vmem:[%s2576_s4 + $0x10] sm:$0xff]  ;;  %v2102_v20 = vmov 0.0|0.0   ;;  %vm2103_vm4 = vmmov 0  }
   0x2   :  { %v33_v1 = vld [vmem:[%s2576_s4] sm:$0xff]  ;;  %1479 = vmatprep.subr.msk.mxu0 %vm99_vm0, %v49_v0  ;;  %v36_v4 = vld [vmem:[%s2576_s4 + $0x18] sm:$0xff]  ;;  %v38_v6 = vld [vmem:[%s2576_s4 + $0x28] sm:$0xff]  ;;  %v2104_v27 = vmov 0.0   ;;  %vm1252_vm5 = vcmask 23552  }
   0x3   :  { %1481 = vmatprep.mubr.msk.f32.mxu0 %vm50_vm1, %v33_v1  ;;  %1480 = vmatpush3.msk.msra.mxu0 %vm99_vm0, %v49_v0  ;;  %v37_v5 = vld [vmem:[%s2576_s4 + $0x20] sm:$0xff]  ;;  %v39_v7 = vld [vmem:[%s2576_s4 + $0x30] sm:$0xff]  ;;  %v40_v8 = vld [vmem:[%s2576_s4 + $0x38] sm:$0xff] }
   0x4   :  { %1482 = vmatmul.mubr.msk.f32.vlgmr.msra.gmra.mrb[0].mxu0 %vm50_vm1, %v34_v2  ;;  %v41_v9 = vld [vmem:[%s2576_s4 + $0x40] sm:$0xff]  ;;  %v42_v10 = vld [vmem:[%s2576_s4 + $0x48] sm:$0xff]  ;;  %v43_v11 = vld [vmem:[%s2576_s4 + $0x50] sm:$0xff]  ;;  %1891 = vmatprep.subr.bf16.mxu0 %v2102_v20 }
   0x5   :  { %1484 = vmatprep.mubr.msk.f32.mxu0 %vm50_vm1, %v35_v3  ;;  %v44_v12 = vld [vmem:[%s2576_s4 + $0x58] sm:$0xff]  ;;  %v45_v13 = vld [vmem:[%s2576_s4 + $0x60] sm:$0xff]  ;;  %v46_v14 = vld [vmem:[%s2576_s4 + $0x68] sm:$0xff] }
   0x6   :  { %v47_v15 = vld [vmem:[%s2576_s4 + $0x70] sm:$0xff]  ;;  %v48_v16 = vld [vmem:[%s2576_s4 + $0x78] sm:$0xff]  ;;  %v282_v17 = vld [vmem:[%s2577_s6] sm:$0xf] }
   0x7   :  { %1505 = vmatprep.subr.msk.mxu1 %vm308_vm2, %v282_v17  ;;  %v274_v18 = vld [vmem:[%s2578_s0] sm:$0xff]  ;;  %v275_v19 = vld [vmem:[%s2578_s0 + $0x8] sm:$0xff]  ;;  %v276_v21 = vld [vmem:[%s2578_s0 + $0x10] sm:$0xff] }
   0x8   :  { %1485 = vmatmul.mubr.msk.f32.gmra.mrb[2].mxu0 %vm50_vm1, %v36_v4  ;;  %1506 = vmatpush3.msk.msra.mxu1 %vm308_vm2, %v282_v17  ;;  %v277_v22 = vld [vmem:[%s2578_s0 + $0x18] sm:$0xff]  ;;  %v278_v23 = vld [vmem:[%s2578_s0 + $0x20] sm:$0xff]  ;;  %v279_v24 = vld [vmem:[%s2578_s0 + $0x28] sm:$0xff] }
   0x9   :  { %1487 = vmatprep.mubr.msk.f32.mxu0 %vm50_vm1, %v37_v5  ;;  %1507 = vmatprep.mubr.msk.f32.mxu1 %vm283_vm3, %v274_v18  ;;  %v280_v25 = vld [vmem:[%s2578_s0 + $0x30] sm:$0xff]  ;;  %v281_v26 = vld [vmem:[%s2578_s0 + $0x38] sm:$0xff]  ;;  %v2287_v43 = vld [vmem:[%s2579_s2] ss:$0 sm:$0xff] }
   0xa   :  { %1508 = vmatmul.mubr.msk.f32.vlgmr.msra.gmra.mrb[0].mxu1 %vm283_vm3, %v275_v19  ;;  %1843 = vmatprep.subr.bf16.mxu1 %v2102_v20  ;;  %2070 = vtanh.f32 %v2287_v43  ;;  %v434_v54 = vld [vmem:[%s2580_s1 + $0x8] sm:$0xff]  ;;  %v436_v59 = vld [vmem:[%s2580_s1 + $0x18] sm:$0xff]  ;;  %v435_v60 = vld [vmem:[%s2580_s1 + $0x10] sm:$0xff] }
   0xb   :  { %1510 = vmatprep.mubr.msk.f32.mxu1 %vm283_vm3, %v276_v21  ;;  %v442_v55 = vmul.f32 0.05, %v434_v54  ;;  %v444_v61 = vmul.f32 0.05, %v436_v59  ;;  %v443_v62 = vmul.f32 0.05, %v435_v60 }
   0xc   :  { %1488 = vmatmul.mubr.msk.f32.gmra.mrb[4].mxu0 %vm50_vm1, %v38_v6  ;;  %v438_v63 = vld [vmem:[%s2580_s1 + $0x28] sm:$0xff]  ;;  %v437_v0 = vld [vmem:[%s2580_s1 + $0x20] sm:$0xff] }
   0xd   :  { %1490 = vmatprep.mubr.msk.f32.mxu0 %vm50_vm1, %v39_v7  ;;  %v446_v4 = vmul.f32 0.05, %v438_v63  ;;  %v445_v6 = vmul.f32 0.05, %v437_v0  ;;  %v440_v7 = vld [vmem:[%s2580_s1 + $0x38] sm:$0xff]  ;;  %v433_v19 = vld [vmem:[%s2580_s1] sm:$0xff] }
   0xe   :  { %1511 = vmatmul.mubr.msk.f32.gmra.mrb[2].mxu1 %vm283_vm3, %v277_v22  ;;  %v441_v21 = vmul.f32 0.05, %v433_v19 }
   0xf   :  { %1513 = vmatprep.mubr.msk.f32.mxu1 %vm283_vm3, %v278_v23  ;;  %v561_v23 = vmul.f32 0.8, %v2287_v43 }
  0x10   :  { %1491 = vmatmul.mubr.msk.f32.gmra.mrb[6].mxu0 %vm50_vm1, %v40_v8  ;;  %v439_v8 = vld [vmem:[%s2580_s1 + $0x30] sm:$0xff] }
  0x11   :  { %1493 = vmatprep.mubr.msk.f32.mxu0 %vm50_vm1, %v41_v9 }
  0x12   :  { %1514 = vmatmul.mubr.msk.f32.gmra.mrb[4].mxu1 %vm283_vm3, %v279_v24 }
  0x13   :  { %1516 = vmatprep.mubr.msk.f32.mxu1 %vm283_vm3, %v280_v25  ;;  %v2368_v25 = vld [vmem:[%s2581_s3] ss:$0 sm:$0xff] }
  0x14   :  { %1494 = vmatmul.mubr.msk.f32.gmra.mrb[8].mxu0 %vm50_vm1, %v42_v10  ;;  %v2071_v53 = vpop.eup %2070 }
  0x15   :  { %1496 = vmatprep.mubr.msk.f32.mxu0 %vm50_vm1, %v43_v11 }
  0x16   :  { %1517 = vmatmul.mubr.msk.f32.gmra.mrb[6].mxu1 %vm283_vm3, %v281_v26 }
  0x17   :  { %1551 = vmatprep.mubr.msk.f32.mxu1 %vm2103_vm4, %v2104_v27 }
  0x18   :  { %1497 = vmatmul.mubr.msk.f32.gmra.mrb[10].mxu0 %vm50_vm1, %v44_v12  ;;  %v448_v12 = vmul.f32 0.05, %v440_v7 }
  0x19   :  { %1499 = vmatprep.mubr.msk.f32.mxu0 %vm50_vm1, %v45_v13 }
  0x1c   :  { %1500 = vmatmul.mubr.msk.f32.gmra.mrb[12].mxu0 %vm50_vm1, %v46_v14  ;;  %v447_v14 = vmul.f32 0.05, %v439_v8 }
  0x1d   :  { %1502 = vmatprep.mubr.msk.f32.mxu0 %vm50_vm1, %v47_v15 }
  0x20   :  { %1503 = vmatmul.mubr.msk.f32.gmra.mrb[14].mxu0 %vm50_vm1, %v48_v16 }
  0x21   :  { %1621 = vmatprep.mubr.msk.f32.mxu0 %vm2103_vm4, %v2104_v27 }
  0xd7   :  { %v1483_v28 = vpop.f32.mrb[0].mxu0 }
  0xd8   :  { %v169_v29 = vpop.f32.mrb[1].mxu0 }
  0xd9   :  { %v2258_v30 = vpack.c.bf16 %v1483_v28, %v169_v29 }
  0xdb   :  { %v1486_v31 = vpop.f32.mrb[2].mxu0  ;;  %1845 = vmatpush3.bf16.msra.mxu1 %v2258_v30  ;;  %1893 = vmatpush3.bf16.msra.mxu0 %v2258_v30 }
  0xdc   :  { %v179_v32 = vpop.f32.mrb[3].mxu0  ;;  %1846 = vmatprep.subr.bf16.mxu1 %v2102_v20  ;;  %1894 = vmatprep.subr.bf16.mxu0 %v2102_v20 }
  0xdd   :  { %v2264_v33 = vpack.c.bf16 %v1486_v31, %v179_v32  ;;  %v1509_v56 = vpop.f32.mrb[0].mxu1 }
  0xde   :  { %v450_v57 = vadd.f32 %v1509_v56, %v442_v55  ;;  %v378_v58 = vpop.f32.mrb[1].mxu1 }
  0xdf   :  { %v1489_v34 = vpop.f32.mrb[4].mxu0  ;;  %1848 = vmatpush3.bf16.msra.mxu1 %v2264_v33  ;;  %1896 = vmatpush3.bf16.msra.mxu0 %v2264_v33  ;;  %v449_v22 = vadd.f32 %v441_v21, %v378_v58  ;;  %v1141_v21 = vld [vmem:[%s2582_s7 + $0x50] sm:$0xff] }
  0xe0   :  { %v189_v35 = vpop.f32.mrb[5].mxu0  ;;  %1849 = vmatprep.subr.bf16.mxu1 %v2102_v20  ;;  %1897 = vmatprep.subr.bf16.mxu0 %v2102_v20 }
  0xe1   :  { %v2270_v36 = vpack.c.bf16 %v1489_v34, %v189_v35  ;;  %v1512_v1 = vpop.f32.mrb[2].mxu1  ;;  %v562_v24 = vadd.f32 %v561_v23, %v449_v22  ;;  %v1142_v22 = vld [vmem:[%s2582_s7 + $0x58] sm:$0xff] }
  0xe2   :  { %v2345_v2 = vadd.f32 %v1512_v1, %v444_v61  ;;  %v388_v3 = vpop.f32.mrb[3].mxu1  ;;  %v2055_v23 = vpack.c.bf16 %v1142_v22, %v1141_v21 }
  0xe3   :  { %v1492_v37 = vpop.f32.mrb[6].mxu0  ;;  %1851 = vmatpush3.bf16.msra.mxu1 %v2270_v36  ;;  %1899 = vmatpush3.bf16.msra.mxu0 %v2270_v36  ;;  %v451_v5 = vadd.f32 %v443_v62, %v388_v3 }
  0xe4   :  { %v199_v38 = vpop.f32.mrb[7].mxu0  ;;  %1852 = vmatprep.subr.bf16.mxu1 %v2102_v20  ;;  %1900 = vmatprep.subr.bf16.mxu0 %v2102_v20 }
  0xe5   :  { %v2276_v39 = vpack.c.bf16 %v1492_v37, %v199_v38  ;;  %v1515_v9 = vpop.f32.mrb[4].mxu1 }
  0xe6   :  { %v2353_v10 = vadd.f32 %v1515_v9, %v446_v4  ;;  %v398_v11 = vpop.f32.mrb[5].mxu1  ;;  %v1135_v9 = vld [vmem:[%s2582_s7 + $0x20] sm:$0xff] }
  0xe7   :  { %v1495_v40 = vpop.f32.mrb[8].mxu0  ;;  %1854 = vmatpush3.bf16.msra.mxu1 %v2276_v39  ;;  %1902 = vmatpush3.bf16.msra.mxu0 %v2276_v39  ;;  %v2355_v13 = vadd.f32 %v445_v6, %v398_v11  ;;  %v1134_v6 = vld [vmem:[%s2582_s7 + $0x18] sm:$0xff] }
  0xe8   :  { %v209_v41 = vpop.f32.mrb[9].mxu0  ;;  %1855 = vmatprep.subr.bf16.mxu1 %v2102_v20  ;;  %1903 = vmatprep.subr.bf16.mxu0 %v2102_v20 }
  0xe9   :  { %v2282_v42 = vpack.c.bf16 %v1495_v40, %v209_v41  ;;  %v1518_v15 = vpop.f32.mrb[6].mxu1 }
  0xea   :  { %v2357_v16 = vadd.f32 %v1518_v15, %v448_v12  ;;  %v408_v17 = vpop.f32.mrb[7].mxu1 }
  0xeb   :  { %v1498_v44 = vpop.f32.mrb[10].mxu0  ;;  %1857 = vmatpush3.bf16.msra.mxu1 %v2282_v42  ;;  %1905 = vmatpush3.bf16.msra.mxu0 %v2282_v42  ;;  %v2359_v18 = vadd.f32 %v447_v14, %v408_v17  ;;  %v1138_v14 = vld [vmem:[%s2582_s7 + $0x38] sm:$0xff]  ;;  %v1139_v17 = vld [vmem:[%s2582_s7 + $0x40] sm:$0xff] }
  0xec   :  { %v219_v45 = vpop.f32.mrb[11].mxu0  ;;  %1858 = vmatprep.subr.bf16.mxu1 %v2102_v20  ;;  %1906 = vmatprep.subr.bf16.mxu0 %v2102_v20 }
  0xed   :  { %v2293_v46 = vpack.c.bf16 %v1498_v44, %v219_v45 }
  0xef   :  { %v1501_v47 = vpop.f32.mrb[12].mxu0  ;;  %1860 = vmatpush3.bf16.msra.mxu1 %v2293_v46  ;;  %1908 = vmatpush3.bf16.msra.mxu0 %v2293_v46 }
  0xf0   :  { %v229_v48 = vpop.f32.mrb[13].mxu0  ;;  %1861 = vmatprep.subr.bf16.mxu1 %v2102_v20  ;;  %1909 = vmatprep.subr.bf16.mxu0 %v2102_v20 }
  0xf1   :  { %v2300_v49 = vpack.c.bf16 %v1501_v47, %v229_v48 }
  0xf3   :  { %v1504_v50 = vpop.f32.mrb[14].mxu0  ;;  %1863 = vmatpush3.bf16.msra.mxu1 %v2300_v49  ;;  %1911 = vmatpush3.bf16.msra.mxu0 %v2300_v49 }
  0xf4   :  { %v239_v51 = vpop.f32.mrb[15].mxu0  ;;  %1864 = vmatprep.subr.bf16.mxu1 %v2102_v20  ;;  %1912 = vmatprep.subr.bf16.mxu0 %v2102_v20 }
  0xf5   :  { %v2306_v52 = vpack.c.bf16 %v1504_v50, %v239_v51 }
  0xf7   :  { %1866 = vmatpush3.bf16.msra.mxu1 %v2306_v52  ;;  %1914 = vmatpush3.bf16.msra.mxu0 %v2306_v52 }
  0xf8   :  { %1867 = vmatprep.subr.bf16.mxu1 %v2102_v20  ;;  %1939 = vmatprep.subr.bf16.mxu0 %v2102_v20 }
  0xfa   :  { %1552 = vmatmul.mubr.f32.vlgmr.msra.gmra.mrb[8].mxu1 %v2071_v53 }
  0xfb   :  { %1869 = vmatpush3.bf16.msra.mxu1 %v2258_v30  ;;  %1586 = vmatprep.mubr.msk.f32.mxu1 %vm2103_vm4, %v2104_v27 }
  0xfc   :  { %1870 = vmatprep.subr.bf16.mxu1 %v2102_v20 }
  0xff   :  { %1872 = vmatpush3.bf16.msra.mxu1 %v2264_v33 }
 0x100   :  { %1873 = vmatprep.subr.bf16.mxu1 %v2102_v20 }
 0x103   :  { %1875 = vmatpush3.bf16.msra.mxu1 %v2270_v36 }
 0x104   :  { %1876 = vmatprep.subr.bf16.mxu1 %v2102_v20 }
 0x107   :  { %1878 = vmatpush3.bf16.msra.mxu1 %v2276_v39 }
 0x108   :  { %1879 = vmatprep.subr.bf16.mxu1 %v2102_v20 }
 0x10b   :  { %1881 = vmatpush3.bf16.msra.mxu1 %v2282_v42 }
 0x10c   :  { %1882 = vmatprep.subr.bf16.mxu1 %v2102_v20 }
 0x10f   :  { %1884 = vmatpush3.bf16.msra.mxu1 %v2293_v46 }
 0x110   :  { %1885 = vmatprep.subr.bf16.mxu1 %v2102_v20 }
 0x113   :  { %1887 = vmatpush3.bf16.msra.mxu1 %v2300_v49 }
 0x114   :  { %1888 = vmatprep.subr.bf16.mxu1 %v2102_v20 }
 0x117   :  { %1890 = vmatpush3.bf16.msra.mxu1 %v2306_v52 }
 0x118   :  { %1915 = vmatprep.subr.bf16.mxu1 %v2102_v20 }
 0x1cd   :  { %v557_v26 = vpop.f32.mrb[8].mxu1 }
 0x1ce   :  { %v2370_v28 = vadd.f32 %v562_v24, %v557_v26  ;;  %v1553_v29 = vpop.f32.mrb[9].mxu1  ;;  %v1143_v24 = vld [vmem:[%s2582_s7 + $0x60] sm:$0xff]  ;;  %v1144_v26 = vld [vmem:[%s2582_s7 + $0x68] sm:$0xff] }
 0x1cf   :  { %v1145_v29 = vld [vmem:[%s2582_s7 + $0x70] sm:$0xff] }
 0x1d0   :  { %v565_v31 = vadd.f32 %v2368_v25, %v2370_v28  ;;  %v639_v32 = vmul.f32 0.8, %v2370_v28 }
 0x1d2   :  { %2072 = vtanh.f32 %v565_v31  ;;  %v640_v34 = vadd.f32 %v639_v32, %v450_v57  ;;  %v1146_v31 = vld [vmem:[%s2582_s7 + $0x78] sm:$0xff] }
 0x1d3   :  { %v2063_v32 = vpack.c.bf16 %v1146_v31, %v1145_v29 }
 0x1dc   :  { %v2073_v35 = vpop.eup %2072 }
 0x1dd   :  { %1587 = vmatmul.mubr.f32.vlgmr.msra.gmra.mrb[10].mxu1 %v2073_v35 }
 0x1de   :  { %1917 = vmatpush3.bf16.msra.mxu1 %v2258_v30  ;;  %1656 = vmatprep.mubr.msk.f32.mxu1 %vm2103_vm4, %v2104_v27 }
 0x1df   :  { %1918 = vmatprep.subr.bf16.mxu1 %v2102_v20 }
 0x1e2   :  { %1920 = vmatpush3.bf16.msra.mxu1 %v2264_v33 }
 0x1e3   :  { %1921 = vmatprep.subr.bf16.mxu1 %v2102_v20 }
 0x1e6   :  { %1923 = vmatpush3.bf16.msra.mxu1 %v2270_v36 }
 0x1e7   :  { %1924 = vmatprep.subr.bf16.mxu1 %v2102_v20 }
 0x1ea   :  { %1926 = vmatpush3.bf16.msra.mxu1 %v2276_v39 }
 0x1eb   :  { %1927 = vmatprep.subr.bf16.mxu1 %v2102_v20 }
 0x1ee   :  { %1929 = vmatpush3.bf16.msra.mxu1 %v2282_v42 }
 0x1ef   :  { %1930 = vmatprep.subr.bf16.mxu1 %v2102_v20 }
 0x1f2   :  { %1932 = vmatpush3.bf16.msra.mxu1 %v2293_v46 }
 0x1f3   :  { %1933 = vmatprep.subr.bf16.mxu1 %v2102_v20 }
 0x1f6   :  { %1935 = vmatpush3.bf16.msra.mxu1 %v2300_v49 }
 0x1f7   :  { %1936 = vmatprep.subr.bf16.mxu1 %v2102_v20 }
 0x1fa   :  { %1938 = vmatpush3.bf16.msra.mxu1 %v2306_v52 }
 0x1fb   :  { %1963 = vmatprep.subr.bf16.mxu1 %v2102_v20 }
 0x2b0   :  { %v635_v37 = vpop.f32.mrb[10].mxu1 }
 0x2b1   :  { %v2393_v38 = vadd.f32 %v640_v34, %v635_v37  ;;  %v1588_v40 = vpop.f32.mrb[11].mxu1 }
 0x2b3   :  { %v643_v41 = vadd.f32 %v2368_v25, %v2393_v38  ;;  %v717_v43 = vmul.f32 0.8, %v2393_v38 }
 0x2b5   :  { %2074 = vtanh.f32 %v643_v41  ;;  %v718_v44 = vadd.f32 %v717_v43, %v451_v5 }
 0x2bf   :  { %v2075_v45 = vpop.eup %2074 }
 0x2c0   :  { %1622 = vmatmul.mubr.f32.vlgmr.msra.gmra.mrb[16].mxu0 %v2075_v45 }
 0x2c1   :  { %1941 = vmatpush3.bf16.msra.mxu0 %v2258_v30  ;;  %1691 = vmatprep.mubr.msk.f32.mxu0 %vm2103_vm4, %v2104_v27 }
 0x2c2   :  { %1942 = vmatprep.subr.bf16.mxu0 %v2102_v20 }
 0x2c5   :  { %1944 = vmatpush3.bf16.msra.mxu0 %v2264_v33 }
 0x2c6   :  { %1945 = vmatprep.subr.bf16.mxu0 %v2102_v20 }
 0x2c9   :  { %1947 = vmatpush3.bf16.msra.mxu0 %v2270_v36 }
 0x2ca   :  { %1948 = vmatprep.subr.bf16.mxu0 %v2102_v20 }
 0x2cd   :  { %1950 = vmatpush3.bf16.msra.mxu0 %v2276_v39 }
 0x2ce   :  { %1951 = vmatprep.subr.bf16.mxu0 %v2102_v20 }
 0x2d1   :  { %1953 = vmatpush3.bf16.msra.mxu0 %v2282_v42 }
 0x2d2   :  { %1954 = vmatprep.subr.bf16.mxu0 %v2102_v20 }
 0x2d5   :  { %1956 = vmatpush3.bf16.msra.mxu0 %v2293_v46 }
 0x2d6   :  { %1957 = vmatprep.subr.bf16.mxu0 %v2102_v20 }
 0x2d9   :  { %1959 = vmatpush3.bf16.msra.mxu0 %v2300_v49 }
 0x2da   :  { %1960 = vmatprep.subr.bf16.mxu0 %v2102_v20 }
 0x2dd   :  { %1962 = vmatpush3.bf16.msra.mxu0 %v2306_v52 }
 0x2de   :  { %1987 = vmatprep.subr.bf16.mxu0 %v2102_v20 }
 0x393   :  { %v713_v47 = vpop.f32.mrb[16].mxu0 }
 0x394   :  { %v2416_v48 = vadd.f32 %v718_v44, %v713_v47  ;;  %v1623_v50 = vpop.f32.mrb[17].mxu0 }
 0x396   :  { %v721_v51 = vadd.f32 %v2368_v25, %v2416_v48  ;;  %v795_v53 = vmul.f32 0.8, %v2416_v48 }
 0x398   :  { %2076 = vtanh.f32 %v721_v51  ;;  %v796_v54 = vadd.f32 %v795_v53, %v2345_v2 }
 0x3a2   :  { %v2077_v55 = vpop.eup %2076 }
 0x3a3   :  { %1657 = vmatmul.mubr.f32.vlgmr.msra.gmra.mrb[12].mxu1 %v2077_v55 }
 0x3a4   :  { %1965 = vmatpush3.bf16.msra.mxu1 %v2258_v30  ;;  %1726 = vmatprep.mubr.msk.f32.mxu1 %vm2103_vm4, %v2104_v27 }
 0x3a5   :  { %1966 = vmatprep.subr.bf16.mxu1 %v2102_v20 }
 0x3a8   :  { %1968 = vmatpush3.bf16.msra.mxu1 %v2264_v33 }
 0x3a9   :  { %1969 = vmatprep.subr.bf16.mxu1 %v2102_v20 }
 0x3ac   :  { %1971 = vmatpush3.bf16.msra.mxu1 %v2270_v36 }
 0x3ad   :  { %1972 = vmatprep.subr.bf16.mxu1 %v2102_v20 }
 0x3b0   :  { %1974 = vmatpush3.bf16.msra.mxu1 %v2276_v39 }
 0x3b1   :  { %1975 = vmatprep.subr.bf16.mxu1 %v2102_v20 }
 0x3b4   :  { %1977 = vmatpush3.bf16.msra.mxu1 %v2282_v42 }
 0x3b5   :  { %1978 = vmatprep.subr.bf16.mxu1 %v2102_v20 }
 0x3b8   :  { %1980 = vmatpush3.bf16.msra.mxu1 %v2293_v46 }
 0x3b9   :  { %1981 = vmatprep.subr.bf16.mxu1 %v2102_v20 }
 0x3bc   :  { %1983 = vmatpush3.bf16.msra.mxu1 %v2300_v49 }
 0x3bd   :  { %1984 = vmatprep.subr.bf16.mxu1 %v2102_v20 }
 0x3c0   :  { %1986 = vmatpush3.bf16.msra.mxu1 %v2306_v52 }
 0x3c1   :  { %2011 = vmatprep.subr.bf16.mxu1 %v2102_v20 }
 0x476   :  { %v791_v56 = vpop.f32.mrb[12].mxu1 }
 0x477   :  { %v2440_v57 = vadd.f32 %v796_v54, %v791_v56  ;;  %v1658_v58 = vpop.f32.mrb[13].mxu1 }
 0x479   :  { %v799_v59 = vadd.f32 %v2368_v25, %v2440_v57  ;;  %v873_v60 = vmul.f32 0.8, %v2440_v57 }
 0x47b   :  { %2078 = vtanh.f32 %v799_v59  ;;  %v874_v61 = vadd.f32 %v873_v60, %v2355_v13  ;;  %v1137_v13 = vld [vmem:[%s2582_s7 + $0x30] sm:$0xff] }
 0x47c   :  { %v2047_v15 = vpack.c.bf16 %v1138_v14, %v1137_v13 }
 0x485   :  { %v2079_v62 = vpop.eup %2078 }
 0x486   :  { %1692 = vmatmul.mubr.f32.vlgmr.msra.gmra.mrb[18].mxu0 %v2079_v62 }
 0x487   :  { %1989 = vmatpush3.bf16.msra.mxu0 %v2258_v30  ;;  %1761 = vmatprep.mubr.msk.f32.mxu0 %vm2103_vm4, %v2104_v27 }
 0x488   :  { %1990 = vmatprep.subr.bf16.mxu0 %v2102_v20 }
 0x48b   :  { %1992 = vmatpush3.bf16.msra.mxu0 %v2264_v33 }
 0x48c   :  { %1993 = vmatprep.subr.bf16.mxu0 %v2102_v20 }
 0x48f   :  { %1995 = vmatpush3.bf16.msra.mxu0 %v2270_v36 }
 0x490   :  { %1996 = vmatprep.subr.bf16.mxu0 %v2102_v20 }
 0x493   :  { %1998 = vmatpush3.bf16.msra.mxu0 %v2276_v39 }
 0x494   :  { %1999 = vmatprep.subr.bf16.mxu0 %v2102_v20 }
 0x497   :  { %2001 = vmatpush3.bf16.msra.mxu0 %v2282_v42 }
 0x498   :  { %2002 = vmatprep.subr.bf16.mxu0 %v2102_v20 }
 0x49b   :  { %2004 = vmatpush3.bf16.msra.mxu0 %v2293_v46 }
 0x49c   :  { %2005 = vmatprep.subr.bf16.mxu0 %v2102_v20 }
 0x49f   :  { %2007 = vmatpush3.bf16.msra.mxu0 %v2300_v49 }
 0x4a0   :  { %2008 = vmatprep.subr.bf16.mxu0 %v2102_v20 }
 0x4a3   :  { %2010 = vmatpush3.bf16.msra.mxu0 %v2306_v52 }
 0x559   :  { %v869_v63 = vpop.f32.mrb[18].mxu0 }
 0x55a   :  { %v2463_v0 = vadd.f32 %v874_v61, %v869_v63  ;;  %v1693_v1 = vpop.f32.mrb[19].mxu0 }
 0x55c   :  { %v877_v2 = vadd.f32 %v2368_v25, %v2463_v0  ;;  %v951_v3 = vmul.f32 0.8, %v2463_v0 }
 0x55e   :  { %2080 = vtanh.f32 %v877_v2  ;;  %v952_v4 = vadd.f32 %v951_v3, %v2353_v10  ;;  %v1136_v10 = vld [vmem:[%s2582_s7 + $0x28] sm:$0xff] }
 0x55f   :  { %v2043_v12 = vpack.c.bf16 %v1136_v10, %v1135_v9 }
 0x568   :  { %v2081_v5 = vpop.eup %2080 }
 0x569   :  { %1727 = vmatmul.mubr.f32.vlgmr.msra.gmra.mrb[14].mxu1 %v2081_v5 }
 0x56a   :  { %2013 = vmatpush3.bf16.msra.mxu1 %v2258_v30  ;;  %1796 = vmatprep.mubr.msk.f32.mxu1 %vm2103_vm4, %v2104_v27  ;;  %v1131_v27 = vld [vmem:[%s2582_s7] sm:$0xff]  ;;  %v1132_v30 = vld [vmem:[%s2582_s7 + $0x8] sm:$0xff] }
 0x56b   :  { %2014 = vmatprep.subr.bf16.mxu1 %v2102_v20 }
 0x56e   :  { %2016 = vmatpush3.bf16.msra.mxu1 %v2264_v33  ;;  %v2035_v33 = vpack.c.bf16 %v1132_v30, %v1131_v27 }
 0x56f   :  { %2017 = vmatprep.subr.bf16.mxu1 %v2102_v20 }
 0x570   :  { %2036 = vmatprep.subr.bf16.mxu0 %v2035_v33 }
 0x572   :  { %2019 = vmatpush3.bf16.msra.mxu1 %v2270_v36 }
 0x573   :  { %2020 = vmatprep.subr.bf16.mxu1 %v2102_v20 }
 0x576   :  { %2022 = vmatpush3.bf16.msra.mxu1 %v2276_v39 }
 0x577   :  { %2023 = vmatprep.subr.bf16.mxu1 %v2102_v20 }
 0x57a   :  { %2025 = vmatpush3.bf16.msra.mxu1 %v2282_v42 }
 0x57b   :  { %2026 = vmatprep.subr.bf16.mxu1 %v2102_v20 }
 0x57e   :  { %2028 = vmatpush3.bf16.msra.mxu1 %v2293_v46 }
 0x57f   :  { %2029 = vmatprep.subr.bf16.mxu1 %v2102_v20 }
 0x582   :  { %2031 = vmatpush3.bf16.msra.mxu1 %v2300_v49 }
 0x583   :  { %2032 = vmatprep.subr.bf16.mxu1 %v2102_v20 }
 0x586   :  { %2034 = vmatpush3.bf16.msra.mxu1 %v2306_v52  ;;  %v1133_v52 = vld [vmem:[%s2582_s7 + $0x10] sm:$0xff] }
 0x587   :  { %v2039_v7 = vpack.c.bf16 %v1134_v6, %v1133_v52 }
 0x63c   :  { %v947_v36 = vpop.f32.mrb[14].mxu1 }
 0x63d   :  { %v953_v39 = vadd.f32 %v952_v4, %v947_v36  ;;  %v1728_v42 = vpop.f32.mrb[15].mxu1 }
 0x63f   :  { %v955_v46 = vadd.f32 %v2368_v25, %v953_v39  ;;  %v1029_v49 = vmul.f32 0.8, %v953_v39 }
 0x641   :  { %2082 = vtanh.f32 %v955_v46  ;;  %v1030_v20 = vadd.f32 %v1029_v49, %v2359_v18  ;;  %v1140_v18 = vld [vmem:[%s2582_s7 + $0x48] sm:$0xff] }
 0x642   :  { %2084 = vtanh.f32 %v2370_v28  ;;  %v2051_v19 = vpack.c.bf16 %v1140_v18, %v1139_v17  ;;  %v2059_v28 = vpack.c.bf16 %v1144_v26, %v1143_v24 }
 0x643   :  { %2086 = vtanh.f32 %v2393_v38 }
 0x644   :  { %2088 = vtanh.f32 %v2416_v48 }
 0x645   :  { %2090 = vtanh.f32 %v2440_v57 }
 0x646   :  { %2092 = vtanh.f32 %v2463_v0 }
 0x647   :  { %2094 = vtanh.f32 %v953_v39 }
 0x64b   :  { %v2083_v8 = vpop.eup %2082 }
 0x64c   :  { %v2085_v11 = vpop.eup %2084  ;;  %1762 = vmatmul.mubr.f32.vlgmr.msra.gmra.mrb[20].mxu0 %v2083_v8 }
 0x64d   :  { %2038 = vmatpush3.bf16.msra.mxu0 %v2035_v33  ;;  %1831 = vmatprep.mubr.f32.mxu0 %v2085_v11  ;;  %v2087_v34 = vpop.eup %2086 }
 0x64e   :  { %2040 = vmatprep.subr.bf16.mxu0 %v2039_v7  ;;  %v2089_v35 = vpop.eup %2088 }
 0x64f   :  { %v2091_v37 = vpop.eup %2090 }
 0x650   :  { %v2093_v40 = vpop.eup %2092 }
 0x651   :  { %2042 = vmatpush3.bf16.msra.mxu0 %v2039_v7  ;;  %v2095_v38 = vpop.eup %2094 }
 0x652   :  { %2044 = vmatprep.subr.bf16.mxu0 %v2043_v12 }
 0x655   :  { %2046 = vmatpush3.bf16.msra.mxu0 %v2043_v12 }
 0x656   :  { %2048 = vmatprep.subr.bf16.mxu0 %v2047_v15 }
 0x659   :  { %2050 = vmatpush3.bf16.msra.mxu0 %v2047_v15 }
 0x65a   :  { %2052 = vmatprep.subr.bf16.mxu0 %v2051_v19 }
 0x65d   :  { %2054 = vmatpush3.bf16.msra.mxu0 %v2051_v19 }
 0x65e   :  { %2056 = vmatprep.subr.bf16.mxu0 %v2055_v23 }
 0x661   :  { %2058 = vmatpush3.bf16.msra.mxu0 %v2055_v23 }
 0x662   :  { %2060 = vmatprep.subr.bf16.mxu0 %v2059_v28 }
 0x665   :  { %2062 = vmatpush3.bf16.msra.mxu0 %v2059_v28 }
 0x666   :  { %2064 = vmatprep.subr.bf16.mxu0 %v2063_v32 }
 0x669   :  { %2066 = vmatpush3.bf16.msra.mxu0 %v2063_v32 }
 0x66c   :  { %1832 = vmatmul.mubr.f32.vlgmr.msra.gmra.mrb[22].mxu0 %v2087_v34 }
 0x66d   :  { %1834 = vmatprep.mubr.f32.mxu0 %v2089_v35 }
 0x670   :  { %1835 = vmatmul.mubr.f32.gmra.mrb[24].mxu0 %v2091_v37 }
 0x671   :  { %1837 = vmatprep.mubr.f32.mxu0 %v2093_v40 }
 0x674   :  { %1838 = vmatmul.mubr.f32.gmra.mrb[26].mxu0 %v2095_v38 }
 0x71f   :  { %v1025_v41 = vpop.f32.mrb[20].mxu0 }
 0x720   :  { %v1031_v43 = vadd.f32 %v1030_v20, %v1025_v41  ;;  %v1763_v44 = vpop.f32.mrb[21].mxu0 }
 0x722   :  { %v1033_v45 = vadd.f32 %v2368_v25, %v1031_v43  ;;  %2096 = vtanh.f32 %v1031_v43  ;;  %v1107_v47 = vmul.f32 0.8, %v1031_v43 }
 0x724   :  { %2098 = vtanh.f32 %v1033_v45  ;;  %v1108_v48 = vadd.f32 %v1107_v47, %v2357_v16 }
 0x72c   :  { %v2097_v50 = vpop.eup %2096 }
 0x72d   :  { %1840 = vmatprep.mubr.f32.mxu0 %v2097_v50 }
 0x72e   :  { %v2099_v51 = vpop.eup %2098 }
 0x72f   :  { %1797 = vmatmul.mubr.f32.vlgmr.msra.gmra.mrb[16].mxu1 %v2099_v51 }
 0x73f   :  { %v1833_v53 = vpop.f32.mrb[22].mxu0 }
 0x740   :  { %1254 = vst.msk [vmem:[%s2583_s8 + $0x8] sm:$0xff] %vm1252_vm5, %v1833_v53  ;;  %v1213_v54 = vpop.f32.mrb[23].mxu0 }
 0x741   :  { %1253 = vst.msk [vmem:[%s2583_s8] sm:$0xff] %vm1252_vm5, %v1213_v54 }
 0x743   :  { %v1836_v25 = vpop.f32.mrb[24].mxu0 }
 0x744   :  { %1256 = vst.msk [vmem:[%s2583_s8 + $0x18] sm:$0xff] %vm1252_vm5, %v1836_v25  ;;  %v1223_v16 = vpop.f32.mrb[25].mxu0 }
 0x745   :  { %1255 = vst.msk [vmem:[%s2583_s8 + $0x10] sm:$0xff] %vm1252_vm5, %v1223_v16 }
 0x747   :  { %v1839_v55 = vpop.f32.mrb[26].mxu0 }
 0x748   :  { %1258 = vst.msk [vmem:[%s2583_s8 + $0x28] sm:$0xff] %vm1252_vm5, %v1839_v55  ;;  %v1233_v56 = vpop.f32.mrb[27].mxu0 }
 0x749   :  { %1257 = vst.msk [vmem:[%s2583_s8 + $0x20] sm:$0xff] %vm1252_vm5, %v1233_v56 }
 0x802   :  { %v1103_v57 = vpop.f32.mrb[16].mxu1 }
 0x803   :  { %v1109_v58 = vadd.f32 %v1108_v48, %v1103_v57  ;;  %v1798_v59 = vpop.f32.mrb[17].mxu1 }
 0x805   :  { %2100 = vtanh.f32 %v1109_v58 }
 0x80f   :  { %v2101_v60 = vpop.eup %2100 }
 0x810   :  { %1841 = vmatmul.mubr.f32.gmra.mrb[28].mxu0 %v2101_v60 }
 0x8e3   :  { %v1842_v61 = vpop.f32.mrb[28].mxu0 }
 0x8e4   :  { %1260 = vst.msk [vmem:[%s2583_s8 + $0x38] sm:$0xff] %vm1252_vm5, %v1842_v61  ;;  %v1243_v62 = vpop.f32.mrb[29].mxu0 }
 0x8e5   :  { %1259 = vst.msk [vmem:[%s2583_s8 + $0x30] sm:$0xff] %vm1252_vm5, %v1243_v62 }

</bundles_post_ra>
